<compile_context>
chip_gen: v7x
topology: tpu7x:2x2x1
jax: 0.10.0
libtpu: 0.0.40
codegen_flags: <defaults>
</compile_context>

<pallas_src>
import functools
import math

import jax
import jax.numpy as jnp
from jax import lax
from jax.experimental import pallas as pl
from jax.experimental.pallas import tpu as pltpu

_LANES = 128
_SUBLANES = 8


def _round_up(x, m):
    return ((x + m - 1) // m) * m


def _lcm(a, b):
    return a * b // math.gcd(a, b)


def _pow_static(base, gamma):
    """base ** gamma with a static gamma; integer gamma stays on the VPU."""
    if isinstance(gamma, int) and not isinstance(gamma, bool):
        if gamma == 0:
            return jnp.ones_like(base)
        if gamma == 1:
            return base
        if gamma == 2:
            return base * base
        return lax.integer_pow(base, gamma)
    return base ** gamma


def _focal_loss_kernel(alpha_ref, logits_ref, targets_ref, out_ref, *,
                       gamma, smooth, tile_rows, fused,
                       needs_mask, full_rows, rem_lanes):
    i = pl.program_id(0)

    x = logits_ref[...].astype(jnp.float32)        # [TR, 128]
    t = targets_ref[...].astype(jnp.float32)       # [TR, 128]
    a = alpha_ref[...].astype(jnp.float32)         # [1, 128] or [TR, 128]

    p = jax.nn.sigmoid(x)                          # 1 EUP push / elem

    if fused:
        # Hard-target (t in {0,1}) rewrite: ONE log + ONE pow on the EUP.
        #   p_base = t*(1-p) + (1-t)*p        (the "(1-pt)" focal base)
        #   pt     = 1 - p_base
        #   a_sel  = t*a + (1-t)*(1-a)
        p_base = p + t * (1.0 - 2.0 * p)
        a_sel = (1.0 - a) + t * (2.0 * a - 1.0)
        w = _pow_static(p_base, gamma)
        loss = -(a_sel * w) * jnp.log((1.0 - p_base) + smooth)
    else:
        # Soft-target fallback: original two-branch formulation.
        one_minus_p = 1.0 - p
        pos_w = _pow_static(one_minus_p, gamma)
        neg_w = _pow_static(p, gamma)
        pos_loss = -a * pos_w * jnp.log(p + smooth)
        neg_loss = -(1.0 - a) * neg_w * jnp.log(one_minus_p + smooth)
        loss = t * pos_loss + (1.0 - t) * neg_loss

    def fold(v):
        # Fold the vreg-stack axis with elementwise VPU adds -> (8,128) slab.
        return v.reshape(tile_rows // _SUBLANES, _SUBLANES, _LANES).sum(axis=0)

    if not needs_mask:
        out_ref[...] = fold(loss)
    else:
        last = pl.num_programs(0) - 1

        @pl.when(i != last)
        def _():
            out_ref[...] = fold(loss)

        @pl.when(i == last)
        def _():
            # Tile-local validity mask over Pallas' implicit block padding and
            # the <128-element lane tail.  Pure select -> no NaN propagation
            # from the undefined padded data; reduction happens after masking.
            row = lax.broadcasted_iota(jnp.int32, loss.shape, 0)
            local_full = jnp.int32(full_rows) - i * jnp.int32(tile_rows)
            valid = row < local_full
            if rem_lanes:
                lane = lax.broadcasted_iota(jnp.int32, loss.shape, 1)
                valid = valid | ((row == local_full) & (lane < rem_lanes))
            out_ref[...] = fold(jnp.where(valid, loss, 0.0))


def _build_alpha(alpha, num_class):
    if alpha is None:
        return jnp.full((num_class,), 0.5, jnp.float32)
    if isinstance(alpha, (int, float)):
        return jnp.full((num_class,), float(alpha), jnp.float32)
    alpha = jnp.asarray(alpha, jnp.float32).reshape(-1)
    if alpha.shape[0] != num_class:
        raise RuntimeError('the length not equal to number of class')
    return alpha


def multilabel_focal_loss(logits, targets, alpha=0.7, *, gamma=2, smooth=1e-4,
                          reduction='mean', hard_targets=True, tile_rows=None):
    """Pallas TPU implementation of MultiLabelFocalLoss forward.

    logits, targets: [B, num_class].  f32 or bf16 (bf16 halves HBM traffic;
    targets may also be int8 -- math is f32 in-kernel).  alpha: scalar, None,
    or [num_class] array (matches the PyTorch module's constructor handling).
    hard_targets=True enables the fused single-log EUP path (exact for 0/1
    targets); pass hard_targets=False for soft/fractional targets.
    """
    # TODO(synk): reduction='none' (unreduced elementwise output) is not
    # implemented in the Pallas path; only 'mean' and 'sum' are supported.
    if reduction not in ('mean', 'sum'):
        raise NotImplementedError(reduction)

    B, C = logits.shape
    N = B * C

    alpha_vec = _build_alpha(alpha, C)

    # alpha pattern period in 128-lane rows of the flattened array.
    P = _lcm(C, _LANES) // _LANES
    base = _lcm(P, _SUBLANES)              # tile_rows must be a multiple of this

    rows = pl.cdiv(N, _LANES)
    lane_pad = rows * _LANES - N           # < 128 elements (0 when N % 128 == 0)

    if tile_rows is None:
        tile_rows = 8192                   # 4 MiB f32 per input block
    tile_rows = max(base, (tile_rows // base) * base)
    tile_rows = min(tile_rows, _round_up(rows, base))

    grid_rows = pl.cdiv(rows, tile_rows)
    needs_mask = (lane_pad != 0) or (rows % tile_rows != 0)
    full_rows = N // _LANES                # number of fully-valid 128-lane rows
    rem_lanes = N % _LANES                 # valid lanes in the (single) tail row

    def _prep(x):
        x = x.reshape(-1)
        if lane_pad:
            # Only ever pads to the next 128-lane boundary (< 128 elements).
            # When N % 128 == 0 the reshape below is a free bitcast (no copy).
            x = jnp.pad(x, (0, lane_pad))
        return x.reshape(rows, _LANES)

    logits2 = _prep(logits)
    targets2 = _prep(targets)

    if P == 1:
        # num_class divides 128: one 128-lane row repeats -> broadcast in-kernel.
        alpha_pat = jnp.tile(alpha_vec, _LANES // C).reshape(1, _LANES)
        alpha_spec = pl.BlockSpec((1, _LANES), lambda i: (0, 0))
    else:
        # Pre-tile on the host; constant block index -> DMA'd once, stays resident.
        alpha_pat = jnp.tile(alpha_vec,
                             (tile_rows * _LANES) // C).reshape(tile_rows, _LANES)
        alpha_spec = pl.BlockSpec((tile_rows, _LANES), lambda i: (0, 0))

    kernel = functools.partial(
        _focal_loss_kernel,
        gamma=gamma, smooth=smooth, tile_rows=tile_rows,
        fused=bool(hard_targets), needs_mask=needs_mask,
        full_rows=full_rows, rem_lanes=rem_lanes)

    partials = pl.pallas_call(
        kernel,
        out_shape=jax.ShapeDtypeStruct((grid_rows, _SUBLANES, _LANES), jnp.float32),
        grid_spec=pltpu.PrefetchScalarGridSpec(
            num_scalar_prefetch=0,
            grid=(grid_rows,),
            in_specs=[
                alpha_spec,                                              # alpha pattern
                pl.BlockSpec((tile_rows, _LANES), lambda i: (i, 0)),     # logits
                pl.BlockSpec((tile_rows, _LANES), lambda i: (i, 0)),     # targets
            ],
            out_specs=pl.BlockSpec((None, _SUBLANES, _LANES),
                                   lambda i: (i, 0, 0)),
        ),
        compiler_params=pltpu.CompilerParams(
            dimension_semantics=("parallel",),     # independent per-tile partials
            vmem_limit_bytes=32 * 1024 * 1024),
    )(alpha_pat, logits2, targets2)

    total = jnp.sum(partials)
    if reduction == 'mean':
        return total / jnp.float32(N)
    return total


def _reference(logits, targets, alpha, gamma=2, smooth=1e-4, reduction='mean'):
    probs = jax.nn.sigmoid(logits.astype(jnp.float32))
    t = targets.astype(jnp.float32)
    a = alpha.astype(jnp.float32)
    pos_loss = -a * (1.0 - probs) ** gamma * jnp.log(probs + smooth)
    neg_loss = -(1.0 - a) * probs ** gamma * jnp.log(1.0 - probs + smooth)
    loss = t * pos_loss + (1.0 - t) * neg_loss
    if reduction == 'mean':
        return jnp.mean(loss)
    return jnp.sum(loss)


if __name__ == "__main__":
    # Module config (deterministic, in-script): num_class=16, alpha=0.7, gamma=2.
    num_class = 16
    batch = 8
    gamma = 2

    key = jax.random.PRNGKey(0)
    k1, k2, k3, k4, k5 = jax.random.split(key, 5)

    # --- Test 1: module defaults (scalar alpha=0.7), hard 0/1 targets, mean. ---
    logits = jax.random.normal(k1, (batch, num_class), dtype=jnp.float32)
    targets = (jax.random.uniform(k2, (batch, num_class)) > 0.5).astype(jnp.float32)
    alpha_vec = jnp.full((num_class,), 0.7, dtype=jnp.float32)

    loss = multilabel_focal_loss(logits, targets, 0.7, gamma=gamma)
    loss = jax.block_until_ready(loss)
    ref = _reference(logits, targets, alpha_vec, gamma=gamma)
    assert jnp.allclose(loss, ref, atol=1e-5, rtol=1e-5), (loss, ref)

    # reduction='sum'
    loss_sum = multilabel_focal_loss(logits, targets, 0.7, gamma=gamma,
                                     reduction='sum')
    loss_sum = jax.block_until_ready(loss_sum)
    ref_sum = _reference(logits, targets, alpha_vec, gamma=gamma, reduction='sum')
    assert jnp.allclose(loss_sum, ref_sum, atol=1e-4, rtol=1e-5), (loss_sum, ref_sum)

    # --- Test 2: multi-tile grid, C not dividing 128 (P>1 resident alpha slab),
    #     partial last block + lane-tail mask, per-class alpha, bf16 targets. ---
    B2, C2 = 300, 24
    logits2 = jax.random.normal(k3, (B2, C2), dtype=jnp.float32)
    targets2 = (jax.random.uniform(k4, (B2, C2)) > 0.5).astype(jnp.bfloat16)
    alpha2 = jnp.linspace(0.1, 0.9, C2, dtype=jnp.float32)
    loss2 = multilabel_focal_loss(logits2, targets2, alpha2, gamma=gamma,
                                  tile_rows=24)
    loss2 = jax.block_until_ready(loss2)
    ref2 = _reference(logits2, targets2, alpha2, gamma=gamma)
    assert jnp.allclose(loss2, ref2, atol=1e-5, rtol=1e-5), (loss2, ref2)

    # --- Test 3: soft targets via the non-fused fallback path. ---
    soft = jax.random.uniform(k5, (batch, num_class), dtype=jnp.float32)
    loss3 = multilabel_focal_loss(logits, soft, 0.7, gamma=gamma,
                                  hard_targets=False)
    loss3 = jax.block_until_ready(loss3)
    ref3 = _reference(logits, soft, alpha_vec, gamma=gamma)
    assert jnp.allclose(loss3, ref3, atol=1e-5, rtol=1e-5), (loss3, ref3)

    print("KERNEL_OK")
</pallas_src>

<mosaic_0001>
module attributes {stable_mosaic.version = 11 : i64} {
  func.func @_focal_loss_kernel(%arg0: i32, %arg1: memref<1x128xf32, #tpu.memory_space<vmem>>, %arg2: memref<8x128xf32, #tpu.memory_space<vmem>>, %arg3: memref<8x128xf32, #tpu.memory_space<vmem>>, %arg4: memref<1x8x128xf32, #tpu.memory_space<vmem>>) attributes {dimension_semantics = [#tpu.dimension_semantics<parallel>], iteration_bounds = array<i64: 1>, scalar_prefetch = 0 : i64, scratch_operands = 0 : i64, tpu.core_type = #tpu.core_type<tc>, window_params = [{pipeline_mode = #tpu.pipeline_mode<synchronous>, transform_indices = @transform_0, window_bounds = array<i64: 1, 128>}, {transform_indices = @transform_1, window_bounds = array<i64: 8, 128>}, {transform_indices = @transform_2, window_bounds = array<i64: 8, 128>}, {transform_indices = @transform_3, window_bounds = array<i64: 1, 8, 128>}]} {
    %c0 = arith.constant 0 : index
    %c0_0 = arith.constant 0 : index
    %0 = vector.load %arg2[%c0, %c0_0] : memref<8x128xf32, #tpu.memory_space<vmem>>, vector<8x128xf32>
    %c0_1 = arith.constant 0 : index
    %c0_2 = arith.constant 0 : index
    %1 = vector.load %arg3[%c0_1, %c0_2] : memref<8x128xf32, #tpu.memory_space<vmem>>, vector<8x128xf32>
    %c0_3 = arith.constant 0 : index
    %c0_4 = arith.constant 0 : index
    %2 = vector.load %arg1[%c0_3, %c0_4] : memref<1x128xf32, #tpu.memory_space<vmem>>, vector<1x128xf32>
    %3 = arith.negf %0 : vector<8x128xf32>
    %4 = math.exp %3 : vector<8x128xf32>
    %cst = arith.constant 1.000000e+00 : f32
    %5 = vector.broadcast %cst : f32 to vector<8x128xf32>
    %6 = arith.addf %5, %4 : vector<8x128xf32>
    %7 = arith.divf %5, %6 : vector<8x128xf32>
    %cst_5 = arith.constant 2.000000e+00 : f32
    %8 = vector.broadcast %cst_5 : f32 to vector<8x128xf32>
    %9 = arith.mulf %8, %7 : vector<8x128xf32>
    %cst_6 = arith.constant 1.000000e+00 : f32
    %10 = vector.broadcast %cst_6 : f32 to vector<8x128xf32>
    %11 = arith.subf %10, %9 : vector<8x128xf32>
    %12 = arith.mulf %1, %11 : vector<8x128xf32>
    %13 = arith.addf %7, %12 : vector<8x128xf32>
    %cst_7 = arith.constant 1.000000e+00 : f32
    %14 = vector.broadcast %cst_7 : f32 to vector<1x128xf32>
    %15 = arith.subf %14, %2 : vector<1x128xf32>
    %cst_8 = arith.constant 2.000000e+00 : f32
    %16 = vector.broadcast %cst_8 : f32 to vector<1x128xf32>
    %17 = arith.mulf %16, %2 : vector<1x128xf32>
    %cst_9 = arith.constant 1.000000e+00 : f32
    %18 = vector.broadcast %cst_9 : f32 to vector<1x128xf32>
    %19 = arith.subf %17, %18 : vector<1x128xf32>
    %20 = vector.broadcast %19 : vector<1x128xf32> to vector<8x128xf32>
    %21 = arith.mulf %1, %20 : vector<8x128xf32>
    %22 = vector.broadcast %15 : vector<1x128xf32> to vector<8x128xf32>
    %23 = arith.addf %22, %21 : vector<8x128xf32>
    %24 = arith.mulf %13, %13 : vector<8x128xf32>
    %25 = arith.mulf %23, %24 : vector<8x128xf32>
    %cst_10 = arith.constant 0.000000e+00 : f32
    %26 = vector.broadcast %cst_10 : f32 to vector<8x128xf32>
    %27 = arith.subf %26, %25 : vector<8x128xf32>
    %cst_11 = arith.constant 1.000000e+00 : f32
    %28 = vector.broadcast %cst_11 : f32 to vector<8x128xf32>
    %29 = arith.subf %28, %13 : vector<8x128xf32>
    %cst_12 = arith.constant 9.99999974E-5 : f32
    %30 = vector.broadcast %cst_12 : f32 to vector<8x128xf32>
    %31 = arith.addf %29, %30 : vector<8x128xf32>
    %32 = math.log %31 : vector<8x128xf32>
    %33 = arith.mulf %27, %32 : vector<8x128xf32>
    %c0_i32 = arith.constant 0 : i32
    %34 = arith.cmpi ne, %arg0, %c0_i32 : i32
    %35 = arith.extui %34 : i1 to i32
    %c0_i32_13 = arith.constant 0 : i32
    %36 = arith.cmpi ne, %35, %c0_i32_13 : i32
    scf.if %36 {
      %40 = vector.shape_cast %33 : vector<8x128xf32> to vector<1x8x128xf32>
      %cst_16 = arith.constant dense<0.000000e+00> : vector<8x128xf32>
      %41 = vector.multi_reduction <add>, %40, %cst_16 [0] : vector<1x8x128xf32> to vector<8x128xf32>
      %c0_17 = arith.constant 0 : index
      %c0_18 = arith.constant 0 : index
      %c0_19 = arith.constant 0 : index
      %42 = vector.load %arg4[%c0_17, %c0_18, %c0_19] : memref<1x8x128xf32, #tpu.memory_space<vmem>>, vector<1x8x128xf32>
      %43 = vector.shape_cast %42 : vector<1x8x128xf32> to vector<8x128xf32>
      %44 = vector.shape_cast %41 : vector<8x128xf32> to vector<1x8x128xf32>
      tpu.vector_store %arg4[%c0_17, %c0_18, %c0_19], %44 {strides = array<i32>} : memref<1x8x128xf32, #tpu.memory_space<vmem>>, vector<1x8x128xf32>,
    } else {
    }
    %c0_i32_14 = arith.constant 0 : i32
    %37 = arith.cmpi eq, %arg0, %c0_i32_14 : i32
    %38 = arith.extui %37 : i1 to i32
    %c0_i32_15 = arith.constant 0 : i32
    %39 = arith.cmpi ne, %38, %c0_i32_15 : i32
    scf.if %39 {
      %40 = tpu.iota {dimensions = array<i32: 0>} : vector<8x128xi32>
      %c8_i32 = arith.constant 8 : i32
      %41 = arith.muli %arg0, %c8_i32 : i32
      %c1_i32 = arith.constant 1 : i32
      %42 = arith.subi %c1_i32, %41 : i32
      %43 = vector.broadcast %42 : i32 to vector<8x128xi32>
      %44 = arith.cmpi slt, %40, %43 : vector<8x128xi32>
      %cst_16 = arith.constant 0.000000e+00 : f32
      %45 = vector.broadcast %cst_16 : f32 to vector<8x128xf32>
      %46 = arith.select %44, %33, %45 : vector<8x128xi1>, vector<8x128xf32>
      %47 = vector.shape_cast %46 : vector<8x128xf32> to vector<1x8x128xf32>
      %cst_17 = arith.constant dense<0.000000e+00> : vector<8x128xf32>
      %48 = vector.multi_reduction <add>, %47, %cst_17 [0] : vector<1x8x128xf32> to vector<8x128xf32>
      %c0_18 = arith.constant 0 : index
      %c0_19 = arith.constant 0 : index
      %c0_20 = arith.constant 0 : index
      %49 = vector.load %arg4[%c0_18, %c0_19, %c0_20] : memref<1x8x128xf32, #tpu.memory_space<vmem>>, vector<1x8x128xf32>
      %50 = vector.shape_cast %49 : vector<1x8x128xf32> to vector<8x128xf32>
      %51 = vector.shape_cast %48 : vector<8x128xf32> to vector<1x8x128xf32>
      tpu.vector_store %arg4[%c0_18, %c0_19, %c0_20], %51 {strides = array<i32>} : memref<1x8x128xf32, #tpu.memory_space<vmem>>, vector<1x8x128xf32>,
    } else {
    }
    return
  }
  func.func @transform_0(%arg0: i32) -> (i32, i32) {
    %c0_i32 = arith.constant 0 : i32
    %c0_i32_0 = arith.constant 0 : i32
    %c0_i32_1 = arith.constant 0 : i32
    return %c0_i32, %c0_i32_0 : i32, i32
  }
  func.func @transform_1(%arg0: i32) -> (i32, i32) {
    %c0_i32 = arith.constant 0 : i32
    %c0_i32_0 = arith.constant 0 : i32
    return %arg0, %c0_i32 : i32, i32
  }
  func.func @transform_2(%arg0: i32) -> (i32, i32) {
    %c0_i32 = arith.constant 0 : i32
    %c0_i32_0 = arith.constant 0 : i32
    return %arg0, %c0_i32 : i32, i32
  }
  func.func @transform_3(%arg0: i32) -> (i32, i32, i32) {
    %c0_i32 = arith.constant 0 : i32
    %c0_i32_0 = arith.constant 0 : i32
    %c0_i32_1 = arith.constant 0 : i32
    return %arg0, %c0_i32, %c0_i32_0 : i32, i32, i32
  }
}

</mosaic_0001>

<bundles_post_ra>
// kernel: tpu_custom_call.1
= control target key start
LH: loop header
LB: loop body
LE: loop exit
PB: predicated region body
PF: predicated region fallthrough
CT: control target
= control target key end

     0   :  { %8 = vsyncpa [#allocation3], 0  ;;  %s209_s0 = inlined_call_operand.hbm [shape: f32[1,128], index: 0, kind: input, shape index: {}]   ;;  %s210_s1 = inlined_call_operand.vmem [shape: f32[1,128], index: 1, kind: input, shape index: {}]   ;;  %s211_s2 = inlined_call_operand.vmem [shape: f32[1,128], index: 2, kind: input, shape index: {}]   ;;  %s212_s3 = inlined_call_operand.hbm [shape: f32[1,8,128], index: 3, kind: output, shape index: {}]  }
   0x1   :  { %9 = vsyncpa [#allocation4], 0  ;;  %s157_s12 = smov [#allocation2]   ;;  %s109_s16 = scalar_lea.hbm %s209_s0, 16 }
   0x2   :  { %s16_s13 = sshll.u32 %s157_s12, 4  ;;  %p110_p0 = scmp.ne.s32.totalorder %s209_s0, %s109_s16  ;;  %s17_s13 = int_to_ptr.vmem [resolvable:$true] %s16_s13 }
   0x3   :  { %p113_p1 = scmp.lt.u32.totalorder %s109_s16, %s209_s0 }
   0x5   :  { %p115_p2 = pnand %p113_p1, %p110_p0 }
   0x7   :  { %118 = shalt.err (!%p115_p2)
}
   0x8   :  { %s119_s21 = scalar_lea.vmem %s17_s13, 16  ;;  %s123_s22 = scalar_lea.vmem %s17_s13, 32 }
   0x9   :  { %p120_p3 = scmp.ne.s32.totalorder %s17_s13, %s119_s21  ;;  %p124_p4 = scmp.lt.s32.totalorder %s17_s13, %s17_s13 }
   0xa   :  { %p125_p5 = scmp.lt.s32.totalorder %s123_s22, %s119_s21 }
   0xc   :  { %p126_p6 = por %p125_p5, %p124_p4 }
   0xe   :  { %p127_p7 = pnand %p126_p6, %p120_p3 }
  0x10   :  { %130 = shalt.err (!%p127_p7)
}
  0x11   :  { %19 = dma.hbm_to_vmem [thread:$0]  %s209_s0, 16, %s17_s13, [#allocation3]  }
  0x12   :  { %153 = dma.done.wait [#allocation3], 16  }
  0x13   :  { %154 = vsyncadd [#allocation3], 4294967280  ;;  %v27_v0 = vld [vmem:[%s210_s1] sm:$0xff]  ;;  %v44_v4 = vlaneseq  ;;  %s158_s0 = smov [#allocation5]  }
  0x14   :  { %v99_v1 = vmul.f32 -1.442695, %v27_v0  ;;  %v29_v5 = vld [vmem:[#allocation2] sm:$0x1]  ;;  %s90_s1 = sshll.u32 %s158_s0, 4  ;;  %s91_s1 = int_to_ptr.vmem [resolvable:$true] %s90_s1 }
  0x15   :  { %v41_v6 = vmul.f32 2.0, %v29_v5  ;;  %v45_v7 = vshrl.u32 %v44_v4, 7  ;;  %v28_v10 = vld [vmem:[%s211_s2] sm:$0xff]  ;;  %v40_v15 = vsub.f32 1.0, %v29_v5  ;;  %s131_s2 = scalar_lea.vmem %s91_s1, 128  ;;  %p136_p9 = scmp.lt.s32.totalorder %s91_s1, %s91_s1 }
  0x16   :  { %103 = vpow2.f32 %v99_v1  ;;  %p132_p8 = scmp.ne.s32.totalorder %s91_s1, %s131_s2  ;;  %p137_p10 = scmp.lt.s32.totalorder %s131_s2, %s131_s2 }
  0x17   :  { %v100_v11 = vadd.f32 -1.0, %v41_v6  ;;  %v46_v12 = vsub.s32 0, %v45_v7  ;;  %vm80_vm0 = vcmp.lt.s32.totalorder %v45_v7, 1 }
  0x18   :  { %p138_p11 = por %p137_p10, %p136_p9 }
  0x19   :  { %v47_v16 = vrot.slane %v100_v11, %v46_v12  ;;  %v54_v20 = vrot.slane %v40_v15, %v46_v12 }
  0x1a   :  { %p139_p12 = pnand %p138_p11, %p132_p8 }
  0x1b   :  { %v49_v19 = vmul.f32 %v47_v16, %v28_v10 }
  0x1d   :  { %v56_v22 = vadd.f32 %v54_v20, %v49_v19 }
  0x20   :  { %v104_v2 = vpop.eup %103 }
  0x21   :  { %v33_v3 = vadd.f32 1.0, %v104_v2 }
  0x23   :  { %105 = vrcp.f32 %v33_v3 }
  0x2d   :  { %v106_v8 = vpop.eup %105 }
  0x2e   :  { %v36_v9 = vmul.f32 2.0, %v106_v8 }
  0x30   :  { %v37_v13 = vsub.f32 1.0, %v36_v9 }
  0x32   :  { %v38_v14 = vmul.f32 %v37_v13, %v28_v10 }
  0x34   :  { %v39_v17 = vadd.f32 %v106_v8, %v38_v14 }
  0x36   :  { %v60_v18 = vsub.f32 1.0, %v39_v17  ;;  %v57_v23 = vmul.f32 %v39_v17, %v39_v17 }
  0x38   :  { %v61_v21 = vadd.f32 0.0001, %v60_v18  ;;  %v58_v24 = vmul.f32 %v57_v23, %v56_v22 }
  0x3a   :  { %107 = vlog2.f32 %v61_v21  ;;  %v59_v25 = vsub.f32 0.0, %v58_v24 }
  0x44   :  { %v108_v26 = vpop.eup %107 }
  0x45   :  { %v63_v27 = vmul.f32 0.6931472, %v108_v26 }
  0x47   :  { %v64_v28 = vmul.f32 %v63_v27, %v59_v25 }
  0x49   :  { %v81_v29 = vsel %vm80_vm0, %v64_v28, 0.0 }
  0x4a   :  { %83 = vst [vmem:[#allocation5] sm:$0xff] %v81_v29 }
  0x4b   :  { %142 = shalt.err (!%p139_p12)
}
  0x4c   :  { %s143_s4 = scalar_lea.hbm %s212_s3, 128 }
  0x4d   :  { %p144_p13 = scmp.ne.s32.totalorder %s212_s3, %s143_s4  ;;  %p147_p0 = scmp.lt.u32.totalorder %s143_s4, %s212_s3 }
  0x4f   :  { %p149_p1 = pnand %p147_p0, %p144_p13 }
  0x51   :  { %152 = shalt.err (!%p149_p1)
}
  0x52   :  { %93 = dma.vmem_to_hbm [thread:$0]  %s91_s1, 128, %s212_s3, [#allocation4]  }
  0x53   :  { %155 = dma.done.wait [#allocation4], 128  }
  0x54   :  { %156 = vsyncadd [#allocation4], 4294967168 }
  0x55   :  { %97 = vsyncpa [#allocation3], 1 }
  0x56   :  { %98 = vsyncpa [#allocation4], 1 }

</bundles_post_ra>
